<compile_context>
chip_gen: v7x
topology: tpu7x:2x2x1
jax: 0.10.0
libtpu: 0.0.40
codegen_flags: <defaults>
</compile_context>

<pallas_src>
import jax
import jax.numpy as jnp
from jax.experimental import pallas as pl
from jax.experimental.pallas import tpu as pltpu


def _cdiv(a, b):
    return -(-a // b)


def dnn_kernel(ids_ref, emb_ref, w1_ref, b1_ref, w2_ref, b2_ref, wp_ref, bp_ref,
               out_ref):
    E, V = emb_ref.shape
    L, two_bt = ids_ref.shape
    Bt = two_bt // 2

    emb_t = emb_ref[...]                                         # (E, V) bf16
    iota_v = jax.lax.broadcasted_iota(jnp.int32, (V, two_bt), 0)  # (V, 2Bt)

    # Fused embedding gather + seq max-pool for BOTH branches at once.
    # ids are packed [premise_tile | hypothesis_tile] along lanes.
    pooled = None
    for j in range(L):                                           # L static & small
        ids_j = ids_ref[j:j + 1, :]                              # (1, 2Bt) int32
        onehot = (iota_v == ids_j).astype(jnp.bfloat16)          # single cast
        emb_j = jnp.dot(emb_t, onehot,
                        preferred_element_type=jnp.float32)      # (E, 2Bt) f32
        pooled = emb_j if pooled is None else jnp.maximum(pooled, emb_j)

    pre = pooled[:, :Bt]                                         # (E, Bt)
    hyp = pooled[:, Bt:]                                         # (E, Bt)

    # torch.cat((pre, hyp), 1): stack along sublanes -> one (H,2E)x(2E,Bt) dot
    x = jnp.concatenate([pre, hyp], axis=0).astype(jnp.bfloat16)  # (2E, Bt)
    x = jnp.dot(w1_ref[...], x, preferred_element_type=jnp.float32) + b1_ref[...]
    x = jnp.maximum(x, 0.0)                                      # (H, Bt) f32

    x = jnp.dot(w2_ref[...], x.astype(jnp.bfloat16),
                preferred_element_type=jnp.float32) + b2_ref[...]
    x = jnp.maximum(x, 0.0)

    logits = jnp.dot(wp_ref[...], x.astype(jnp.bfloat16),
                     preferred_element_type=jnp.float32) + bp_ref[...]  # (1, Bt)
    # sigmoid: exp on the EUP, divide via approximate reciprocal (vrcp)
    out_ref[...] = pl.reciprocal(1.0 + jnp.exp(-logits), approx=True)


def prepare_params(params):
    """One-time weight prep (hoisted out of the per-call forward)."""
    return {
        "emb_t": params["embedding"].T.astype(jnp.bfloat16),    # (E, V)
        "w1":    params["w1"].astype(jnp.bfloat16),             # (H, 2E) kept whole
        "b1":    params["b1"][:, None].astype(jnp.float32),     # (H, 1)
        "w2":    params["w2"].astype(jnp.bfloat16),             # (H, H)
        "b2":    params["b2"][:, None].astype(jnp.float32),     # (H, 1)
        "wp":    params["wp"].astype(jnp.bfloat16),             # (1, H)
        "bp":    params["bp"][:, None].astype(jnp.float32),     # (1, 1)
    }


def _choose_tiling(B):
    """Pad batch to 128-lane multiples; >=2 tiles when B > 128 (v7x megacore),
    tiles capped at 2048 rows; last tile never mostly padding."""
    n128 = _cdiv(B, 128)                     # batch in 128-lane units (>= 1)
    if n128 == 1:
        num_tiles = 1
    else:
        num_tiles = max(2, _cdiv(n128, 16))  # 16 * 128 = 2048-row tile cap
    B_tile = _cdiv(n128, num_tiles) * 128
    num_tiles = _cdiv(n128 * 128, B_tile)
    Bp = num_tiles * B_tile
    return Bp, B_tile, num_tiles


@jax.jit
def dnn_forward(premise, hypothesis, p):
    """premise, hypothesis: (B, L) int32 token ids."""
    B, L = premise.shape
    E, V = p["emb_t"].shape
    H = p["w2"].shape[0]

    Bp, B_tile, num_tiles = _choose_tiling(B)
    pad = Bp - B

    # ids passed seq-major so the batch sits on the lane axis in-kernel
    pre_t = premise.T.astype(jnp.int32)      # (L, B)
    hyp_t = hypothesis.T.astype(jnp.int32)
    if pad:
        pre_t = jnp.pad(pre_t, ((0, 0), (0, pad)))   # padded cols use token 0
        hyp_t = jnp.pad(hyp_t, ((0, 0), (0, pad)))

    # per-tile packing: tile i holds [premise cols | hypothesis cols]
    ids = jnp.concatenate(
        [pre_t.reshape(L, num_tiles, B_tile),
         hyp_t.reshape(L, num_tiles, B_tile)], axis=2).reshape(L, 2 * Bp)

    ids_spec = pl.BlockSpec((L, 2 * B_tile), lambda i: (0, i))
    resident = lambda shape: pl.BlockSpec(shape, lambda i: (0, 0))

    flops = Bp * (4 * L * V * E + 4 * H * E + 2 * H * H + 2 * H)
    bytes_accessed = (2 * Bp * L * 4 + E * V * 2 + H * 2 * E * 2
                      + H * H * 2 + H * 2 + (2 * H + 2) * 4 + Bp * 4)

    # Raise the scoped-VMEM limit only when the (double-buffered) resident
    # table + per-tile working set would exceed the default (no-op at small V).
    bytes_resident = E * V * 2 + H * 2 * E * 2 + H * H * 2 + H * 2 + (2 * H + 2) * 4
    bytes_tile = (L * 2 * B_tile * 4 + V * 2 * B_tile * 2
                  + 2 * E * 2 * B_tile * 4 + 4 * H * B_tile * 4 + 2 * B_tile * 4)
    vmem_est = 2 * (bytes_resident + bytes_tile)
    vmem_limit = int(min(vmem_est + (8 << 20), 64 << 20)) if vmem_est > (12 << 20) else None

    out = pl.pallas_call(
        dnn_kernel,
        out_shape=jax.ShapeDtypeStruct((1, Bp), jnp.float32),
        grid=(num_tiles,),
        in_specs=[
            ids_spec,
            resident((E, V)),
            resident((H, 2 * E)), resident((H, 1)),
            resident((H, H)), resident((H, 1)),
            resident((1, H)), resident((1, 1)),
        ],
        out_specs=pl.BlockSpec((1, B_tile), lambda i: (0, i)),
        compiler_params=pltpu.CompilerParams(
            dimension_semantics=("parallel",),
            vmem_limit_bytes=vmem_limit),
        cost_estimate=pl.CostEstimate(flops=flops, transcendentals=2 * Bp,
                                      bytes_accessed=bytes_accessed),
    )(ids, p["emb_t"], p["w1"], p["b1"], p["w2"], p["b2"], p["wp"], p["bp"])

    return out[0, :B]    # .squeeze(1) equivalent


def init_params(key, vocab_size, embedding_dim, hidden_size):
    ks = jax.random.split(key, 7)
    scale = 0.1
    return {
        "embedding": scale * jax.random.normal(ks[0], (vocab_size, embedding_dim), jnp.float32),
        # nn.Linear(embedding_dim * 2, hidden_size): weight (H, 2E), bias (H,)
        "w1": scale * jax.random.normal(ks[1], (hidden_size, embedding_dim * 2), jnp.float32),
        "b1": scale * jax.random.normal(ks[2], (hidden_size,), jnp.float32),
        # nn.Linear(hidden_size, hidden_size)
        "w2": scale * jax.random.normal(ks[3], (hidden_size, hidden_size), jnp.float32),
        "b2": scale * jax.random.normal(ks[4], (hidden_size,), jnp.float32),
        # layer_pred = nn.Linear(hidden_size, 1)
        "wp": scale * jax.random.normal(ks[5], (1, hidden_size), jnp.float32),
        "bp": scale * jax.random.normal(ks[6], (1,), jnp.float32),
    }


def reference_forward(premise, hypothesis, params):
    emb = params["embedding"]
    pre = jnp.max(jnp.take(emb, premise, axis=0), axis=1)
    hyp = jnp.max(jnp.take(emb, hypothesis, axis=0), axis=1)
    x = jnp.concatenate([pre, hyp], axis=1)
    x = jnp.maximum(x @ params["w1"].T + params["b1"], 0.0)
    x = jnp.maximum(x @ params["w2"].T + params["b2"], 0.0)
    logits = x @ params["wp"].T + params["bp"]
    return jax.nn.sigmoid(logits)[:, 0]


if __name__ == "__main__":
    key = jax.random.PRNGKey(0)
    k_param, k_pre, k_hyp = jax.random.split(key, 3)

    VOCAB, EMBED, HIDDEN = 50, 16, 32
    B, L = 8, 8

    params = init_params(k_param, VOCAB, EMBED, HIDDEN)
    premise = jax.random.randint(k_pre, (B, L), 0, VOCAB, dtype=jnp.int32)
    hypothesis = jax.random.randint(k_hyp, (B, L), 0, VOCAB, dtype=jnp.int32)

    prepped = prepare_params(params)
    out = dnn_forward(premise, hypothesis, prepped)
    jax.block_until_ready(out)

    assert out.shape == (B,), out.shape
    assert bool(jnp.all((out >= 0.0) & (out <= 1.0)))

    ref = reference_forward(premise, hypothesis, params)
    max_err = float(jnp.max(jnp.abs(out - ref)))
    assert max_err < 1e-2, f"mismatch vs f32 reference: {max_err}"

    print("KERNEL_OK")
</pallas_src>

<mosaic_0001>
module attributes {stable_mosaic.version = 11 : i64} {
  func.func @dnn_kernel(%arg0: i32, %arg1: memref<8x256xi32, #tpu.memory_space<vmem>>, %arg2: memref<16x50xbf16, #tpu.memory_space<vmem>>, %arg3: memref<32x32xbf16, #tpu.memory_space<vmem>>, %arg4: memref<32x1xf32, #tpu.memory_space<vmem>>, %arg5: memref<32x32xbf16, #tpu.memory_space<vmem>>, %arg6: memref<32x1xf32, #tpu.memory_space<vmem>>, %arg7: memref<1x32xbf16, #tpu.memory_space<vmem>>, %arg8: memref<1x1xf32, #tpu.memory_space<vmem>>, %arg9: memref<1x128xf32, #tpu.memory_space<vmem>>) attributes {dimension_semantics = [#tpu.dimension_semantics<parallel>], iteration_bounds = array<i64: 1>, scalar_prefetch = 0 : i64, scratch_operands = 0 : i64, tpu.core_type = #tpu.core_type<tc>, window_params = [{transform_indices = @transform_0, window_bounds = array<i64: 8, 256>}, {pipeline_mode = #tpu.pipeline_mode<synchronous>, transform_indices = @transform_1, window_bounds = array<i64: 16, 50>}, {pipeline_mode = #tpu.pipeline_mode<synchronous>, transform_indices = @transform_2, window_bounds = array<i64: 32, 32>}, {pipeline_mode = #tpu.pipeline_mode<synchronous>, transform_indices = @transform_3, window_bounds = array<i64: 32, 1>}, {pipeline_mode = #tpu.pipeline_mode<synchronous>, transform_indices = @transform_4, window_bounds = array<i64: 32, 32>}, {pipeline_mode = #tpu.pipeline_mode<synchronous>, transform_indices = @transform_5, window_bounds = array<i64: 32, 1>}, {pipeline_mode = #tpu.pipeline_mode<synchronous>, transform_indices = @transform_6, window_bounds = array<i64: 1, 32>}, {pipeline_mode = #tpu.pipeline_mode<synchronous>, transform_indices = @transform_7, window_bounds = array<i64: 1, 1>}, {transform_indices = @transform_8, window_bounds = array<i64: 1, 128>}]} {
    %c0 = arith.constant 0 : index
    %c0_0 = arith.constant 0 : index
    %0 = vector.load %arg2[%c0, %c0_0] : memref<16x50xbf16, #tpu.memory_space<vmem>>, vector<16x50xbf16>
    %1 = tpu.iota {dimensions = array<i32: 0>} : vector<50x256xi32>
    %c0_1 = arith.constant 0 : index
    %c0_2 = arith.constant 0 : index
    %2 = vector.load %arg1[%c0_1, %c0_2] : memref<8x256xi32, #tpu.memory_space<vmem>>, vector<1x256xi32>
    %3 = vector.broadcast %2 : vector<1x256xi32> to vector<50x256xi32>
    %4 = arith.cmpi eq, %1, %3 : vector<50x256xi32>
    %5 = arith.extui %4 : vector<50x256xi1> to vector<50x256xi32>
    %6 = arith.sitofp %5 : vector<50x256xi32> to vector<50x256xf32>
    %7 = arith.truncf %6 : vector<50x256xf32> to vector<50x256xbf16>
    %cst = arith.constant dense<0.000000e+00> : vector<16x256xf32>
    %8 = tpu.matmul %0, %7, %cst {dimension_numbers = #tpu.dot_dimension_numbers<[1], [0], [0], [1], [0, 0, 1, 1], [], []>} : vector<16x50xbf16>, vector<50x256xbf16>, vector<16x256xf32> -> vector<16x256xf32>
    %c1 = arith.constant 1 : index
    %c0_3 = arith.constant 0 : index
    %9 = vector.load %arg1[%c1, %c0_3] : memref<8x256xi32, #tpu.memory_space<vmem>>, vector<1x256xi32>
    %10 = vector.broadcast %9 : vector<1x256xi32> to vector<50x256xi32>
    %11 = arith.cmpi eq, %1, %10 : vector<50x256xi32>
    %12 = arith.extui %11 : vector<50x256xi1> to vector<50x256xi32>
    %13 = arith.sitofp %12 : vector<50x256xi32> to vector<50x256xf32>
    %14 = arith.truncf %13 : vector<50x256xf32> to vector<50x256xbf16>
    %cst_4 = arith.constant dense<0.000000e+00> : vector<16x256xf32>
    %15 = tpu.matmul %0, %14, %cst_4 {dimension_numbers = #tpu.dot_dimension_numbers<[1], [0], [0], [1], [0, 0, 1, 1], [], []>} : vector<16x50xbf16>, vector<50x256xbf16>, vector<16x256xf32> -> vector<16x256xf32>
    %16 = arith.maximumf %8, %15 : vector<16x256xf32>
    %c2 = arith.constant 2 : index
    %c0_5 = arith.constant 0 : index
    %17 = vector.load %arg1[%c2, %c0_5] : memref<8x256xi32, #tpu.memory_space<vmem>>, vector<1x256xi32>
    %18 = vector.broadcast %17 : vector<1x256xi32> to vector<50x256xi32>
    %19 = arith.cmpi eq, %1, %18 : vector<50x256xi32>
    %20 = arith.extui %19 : vector<50x256xi1> to vector<50x256xi32>
    %21 = arith.sitofp %20 : vector<50x256xi32> to vector<50x256xf32>
    %22 = arith.truncf %21 : vector<50x256xf32> to vector<50x256xbf16>
    %cst_6 = arith.constant dense<0.000000e+00> : vector<16x256xf32>
    %23 = tpu.matmul %0, %22, %cst_6 {dimension_numbers = #tpu.dot_dimension_numbers<[1], [0], [0], [1], [0, 0, 1, 1], [], []>} : vector<16x50xbf16>, vector<50x256xbf16>, vector<16x256xf32> -> vector<16x256xf32>
    %24 = arith.maximumf %16, %23 : vector<16x256xf32>
    %c3 = arith.constant 3 : index
    %c0_7 = arith.constant 0 : index
    %25 = vector.load %arg1[%c3, %c0_7] : memref<8x256xi32, #tpu.memory_space<vmem>>, vector<1x256xi32>
    %26 = vector.broadcast %25 : vector<1x256xi32> to vector<50x256xi32>
    %27 = arith.cmpi eq, %1, %26 : vector<50x256xi32>
    %28 = arith.extui %27 : vector<50x256xi1> to vector<50x256xi32>
    %29 = arith.sitofp %28 : vector<50x256xi32> to vector<50x256xf32>
    %30 = arith.truncf %29 : vector<50x256xf32> to vector<50x256xbf16>
    %cst_8 = arith.constant dense<0.000000e+00> : vector<16x256xf32>
    %31 = tpu.matmul %0, %30, %cst_8 {dimension_numbers = #tpu.dot_dimension_numbers<[1], [0], [0], [1], [0, 0, 1, 1], [], []>} : vector<16x50xbf16>, vector<50x256xbf16>, vector<16x256xf32> -> vector<16x256xf32>
    %32 = arith.maximumf %24, %31 : vector<16x256xf32>
    %c4 = arith.constant 4 : index
    %c0_9 = arith.constant 0 : index
    %33 = vector.load %arg1[%c4, %c0_9] : memref<8x256xi32, #tpu.memory_space<vmem>>, vector<1x256xi32>
    %34 = vector.broadcast %33 : vector<1x256xi32> to vector<50x256xi32>
    %35 = arith.cmpi eq, %1, %34 : vector<50x256xi32>
    %36 = arith.extui %35 : vector<50x256xi1> to vector<50x256xi32>
    %37 = arith.sitofp %36 : vector<50x256xi32> to vector<50x256xf32>
    %38 = arith.truncf %37 : vector<50x256xf32> to vector<50x256xbf16>
    %cst_10 = arith.constant dense<0.000000e+00> : vector<16x256xf32>
    %39 = tpu.matmul %0, %38, %cst_10 {dimension_numbers = #tpu.dot_dimension_numbers<[1], [0], [0], [1], [0, 0, 1, 1], [], []>} : vector<16x50xbf16>, vector<50x256xbf16>, vector<16x256xf32> -> vector<16x256xf32>
    %40 = arith.maximumf %32, %39 : vector<16x256xf32>
    %c5 = arith.constant 5 : index
    %c0_11 = arith.constant 0 : index
    %41 = vector.load %arg1[%c5, %c0_11] : memref<8x256xi32, #tpu.memory_space<vmem>>, vector<1x256xi32>
    %42 = vector.broadcast %41 : vector<1x256xi32> to vector<50x256xi32>
    %43 = arith.cmpi eq, %1, %42 : vector<50x256xi32>
    %44 = arith.extui %43 : vector<50x256xi1> to vector<50x256xi32>
    %45 = arith.sitofp %44 : vector<50x256xi32> to vector<50x256xf32>
    %46 = arith.truncf %45 : vector<50x256xf32> to vector<50x256xbf16>
    %cst_12 = arith.constant dense<0.000000e+00> : vector<16x256xf32>
    %47 = tpu.matmul %0, %46, %cst_12 {dimension_numbers = #tpu.dot_dimension_numbers<[1], [0], [0], [1], [0, 0, 1, 1], [], []>} : vector<16x50xbf16>, vector<50x256xbf16>, vector<16x256xf32> -> vector<16x256xf32>
    %48 = arith.maximumf %40, %47 : vector<16x256xf32>
    %c6 = arith.constant 6 : index
    %c0_13 = arith.constant 0 : index
    %49 = vector.load %arg1[%c6, %c0_13] : memref<8x256xi32, #tpu.memory_space<vmem>>, vector<1x256xi32>
    %50 = vector.broadcast %49 : vector<1x256xi32> to vector<50x256xi32>
    %51 = arith.cmpi eq, %1, %50 : vector<50x256xi32>
    %52 = arith.extui %51 : vector<50x256xi1> to vector<50x256xi32>
    %53 = arith.sitofp %52 : vector<50x256xi32> to vector<50x256xf32>
    %54 = arith.truncf %53 : vector<50x256xf32> to vector<50x256xbf16>
    %cst_14 = arith.constant dense<0.000000e+00> : vector<16x256xf32>
    %55 = tpu.matmul %0, %54, %cst_14 {dimension_numbers = #tpu.dot_dimension_numbers<[1], [0], [0], [1], [0, 0, 1, 1], [], []>} : vector<16x50xbf16>, vector<50x256xbf16>, vector<16x256xf32> -> vector<16x256xf32>
    %56 = arith.maximumf %48, %55 : vector<16x256xf32>
    %c7 = arith.constant 7 : index
    %c0_15 = arith.constant 0 : index
    %57 = vector.load %arg1[%c7, %c0_15] : memref<8x256xi32, #tpu.memory_space<vmem>>, vector<1x256xi32>
    %58 = vector.broadcast %57 : vector<1x256xi32> to vector<50x256xi32>
    %59 = arith.cmpi eq, %1, %58 : vector<50x256xi32>
    %60 = arith.extui %59 : vector<50x256xi1> to vector<50x256xi32>
    %61 = arith.sitofp %60 : vector<50x256xi32> to vector<50x256xf32>
    %62 = arith.truncf %61 : vector<50x256xf32> to vector<50x256xbf16>
    %cst_16 = arith.constant dense<0.000000e+00> : vector<16x256xf32>
    %63 = tpu.matmul %0, %62, %cst_16 {dimension_numbers = #tpu.dot_dimension_numbers<[1], [0], [0], [1], [0, 0, 1, 1], [], []>} : vector<16x50xbf16>, vector<50x256xbf16>, vector<16x256xf32> -> vector<16x256xf32>
    %64 = arith.maximumf %56, %63 : vector<16x256xf32>
    %65 = vector.extract_strided_slice %64 {offsets = [0, 0], sizes = [16, 128], strides = [1, 1]} : vector<16x256xf32> to vector<16x128xf32>
    %66 = vector.extract_strided_slice %64 {offsets = [0, 128], sizes = [16, 128], strides = [1, 1]} : vector<16x256xf32> to vector<16x128xf32>
    %67 = tpu.concatenate %65, %66 in 0 : vector<16x128xf32>, vector<16x128xf32> -> vector<32x128xf32>
    %68 = arith.truncf %67 : vector<32x128xf32> to vector<32x128xbf16>
    %c0_17 = arith.constant 0 : index
    %c0_18 = arith.constant 0 : index
    %69 = vector.load %arg3[%c0_17, %c0_18] : memref<32x32xbf16, #tpu.memory_space<vmem>>, vector<32x32xbf16>
    %cst_19 = arith.constant dense<0.000000e+00> : vector<32x128xf32>
    %70 = tpu.matmul %69, %68, %cst_19 {dimension_numbers = #tpu.dot_dimension_numbers<[1], [0], [0], [1], [0, 0, 1, 1], [], []>} : vector<32x32xbf16>, vector<32x128xbf16>, vector<32x128xf32> -> vector<32x128xf32>
    %c0_20 = arith.constant 0 : index
    %c0_21 = arith.constant 0 : index
    %71 = vector.load %arg4[%c0_20, %c0_21] : memref<32x1xf32, #tpu.memory_space<vmem>>, vector<32x1xf32>
    %72 = vector.broadcast %71 : vector<32x1xf32> to vector<32x128xf32>
    %73 = arith.addf %70, %72 : vector<32x128xf32>
    %cst_22 = arith.constant 0.000000e+00 : f32
    %74 = vector.broadcast %cst_22 : f32 to vector<32x128xf32>
    %75 = arith.maximumf %73, %74 : vector<32x128xf32>
    %c0_23 = arith.constant 0 : index
    %c0_24 = arith.constant 0 : index
    %76 = vector.load %arg5[%c0_23, %c0_24] : memref<32x32xbf16, #tpu.memory_space<vmem>>, vector<32x32xbf16>
    %77 = arith.truncf %75 : vector<32x128xf32> to vector<32x128xbf16>
    %cst_25 = arith.constant dense<0.000000e+00> : vector<32x128xf32>
    %78 = tpu.matmul %76, %77, %cst_25 {dimension_numbers = #tpu.dot_dimension_numbers<[1], [0], [0], [1], [0, 0, 1, 1], [], []>} : vector<32x32xbf16>, vector<32x128xbf16>, vector<32x128xf32> -> vector<32x128xf32>
    %c0_26 = arith.constant 0 : index
    %c0_27 = arith.constant 0 : index
    %79 = vector.load %arg6[%c0_26, %c0_27] : memref<32x1xf32, #tpu.memory_space<vmem>>, vector<32x1xf32>
    %80 = vector.broadcast %79 : vector<32x1xf32> to vector<32x128xf32>
    %81 = arith.addf %78, %80 : vector<32x128xf32>
    %cst_28 = arith.constant 0.000000e+00 : f32
    %82 = vector.broadcast %cst_28 : f32 to vector<32x128xf32>
    %83 = arith.maximumf %81, %82 : vector<32x128xf32>
    %c0_29 = arith.constant 0 : index
    %c0_30 = arith.constant 0 : index
    %84 = vector.load %arg7[%c0_29, %c0_30] : memref<1x32xbf16, #tpu.memory_space<vmem>>, vector<1x32xbf16>
    %85 = arith.truncf %83 : vector<32x128xf32> to vector<32x128xbf16>
    %cst_31 = arith.constant dense<0.000000e+00> : vector<1x128xf32>
    %86 = tpu.matmul %84, %85, %cst_31 {dimension_numbers = #tpu.dot_dimension_numbers<[1], [0], [0], [1], [0, 0, 1, 1], [], []>} : vector<1x32xbf16>, vector<32x128xbf16>, vector<1x128xf32> -> vector<1x128xf32>
    %c0_32 = arith.constant 0 : index
    %c0_33 = arith.constant 0 : index
    %87 = vector.load %arg8[%c0_32, %c0_33] : memref<1x1xf32, #tpu.memory_space<vmem>>, vector<1x1xf32>
    %88 = vector.broadcast %87 : vector<1x1xf32> to vector<1x128xf32>
    %89 = arith.addf %86, %88 : vector<1x128xf32>
    %cst_34 = arith.constant 0.000000e+00 : f32
    %90 = vector.broadcast %cst_34 : f32 to vector<1x128xf32>
    %91 = arith.subf %90, %89 : vector<1x128xf32>
    %92 = math.exp %91 : vector<1x128xf32>
    %cst_35 = arith.constant 1.000000e+00 : f32
    %93 = vector.broadcast %cst_35 : f32 to vector<1x128xf32>
    %94 = arith.addf %93, %92 : vector<1x128xf32>
    %95 = tpu.reciprocal %94 {approx = true} : vector<1x128xf32> -> vector<1x128xf32>
    %c0_36 = arith.constant 0 : index
    %c0_37 = arith.constant 0 : index
    %96 = vector.load %arg9[%c0_36, %c0_37] : memref<1x128xf32, #tpu.memory_space<vmem>>, vector<1x128xf32>
    tpu.vector_store %arg9[%c0_36, %c0_37], %95 {strides = array<i32>} : memref<1x128xf32, #tpu.memory_space<vmem>>, vector<1x128xf32>,
    return
  }
  func.func @transform_0(%arg0: i32) -> (i32, i32) {
    %c0_i32 = arith.constant 0 : i32
    %c0_i32_0 = arith.constant 0 : i32
    return %c0_i32, %arg0 : i32, i32
  }
  func.func @transform_1(%arg0: i32) -> (i32, i32) {
    %c0_i32 = arith.constant 0 : i32
    %c0_i32_0 = arith.constant 0 : i32
    %c0_i32_1 = arith.constant 0 : i32
    return %c0_i32, %c0_i32_0 : i32, i32
  }
  func.func @transform_2(%arg0: i32) -> (i32, i32) {
    %c0_i32 = arith.constant 0 : i32
    %c0_i32_0 = arith.constant 0 : i32
    %c0_i32_1 = arith.constant 0 : i32
    return %c0_i32, %c0_i32_0 : i32, i32
  }
  func.func @transform_3(%arg0: i32) -> (i32, i32) {
    %c0_i32 = arith.constant 0 : i32
    %c0_i32_0 = arith.constant 0 : i32
    %c0_i32_1 = arith.constant 0 : i32
    return %c0_i32, %c0_i32_0 : i32, i32
  }
  func.func @transform_4(%arg0: i32) -> (i32, i32) {
    %c0_i32 = arith.constant 0 : i32
    %c0_i32_0 = arith.constant 0 : i32
    %c0_i32_1 = arith.constant 0 : i32
    return %c0_i32, %c0_i32_0 : i32, i32
  }
  func.func @transform_5(%arg0: i32) -> (i32, i32) {
    %c0_i32 = arith.constant 0 : i32
    %c0_i32_0 = arith.constant 0 : i32
    %c0_i32_1 = arith.constant 0 : i32
    return %c0_i32, %c0_i32_0 : i32, i32
  }
  func.func @transform_6(%arg0: i32) -> (i32, i32) {
    %c0_i32 = arith.constant 0 : i32
    %c0_i32_0 = arith.constant 0 : i32
    %c0_i32_1 = arith.constant 0 : i32
    return %c0_i32, %c0_i32_0 : i32, i32
  }
  func.func @transform_7(%arg0: i32) -> (i32, i32) {
    %c0_i32 = arith.constant 0 : i32
    %c0_i32_0 = arith.constant 0 : i32
    %c0_i32_1 = arith.constant 0 : i32
    return %c0_i32, %c0_i32_0 : i32, i32
  }
  func.func @transform_8(%arg0: i32) -> (i32, i32) {
    %c0_i32 = arith.constant 0 : i32
    %c0_i32_0 = arith.constant 0 : i32
    return %c0_i32, %arg0 : i32, i32
  }
}

</mosaic_0001>

<bundles_post_ra>
// kernel: dnn_forward.1
= control target key start
LH: loop header
LB: loop body
LE: loop exit
PB: predicated region body
PF: predicated region fallthrough
CT: control target
= control target key end

     0   :  { %v34_v0 = vlaneseq  ;;  %v1507_v4 = vmov 0   ;;  %v1508_v17 = vmov 1.0|1.0   ;;  %v1509_v21 = vmov 0.0   ;;  %s2268_s0 = inlined_call_operand.vmem [shape: s32[8,256], index: 0, kind: input, shape index: {}]   ;;  %s2269_s1 = inlined_call_operand.vmem [shape: bf16[16,50], index: 1, kind: input, shape index: {}]   ;;  %s2270_s2 = inlined_call_operand.vmem [shape: bf16[32,32], index: 2, kind: input, shape index: {}]   ;;  %s2271_s3 = inlined_call_operand.vmem [shape: f32[32,1], index: 3, kind: input, shape index: {}]   ;;  %s2272_s7 = inlined_call_operand.<no memory space> [shape: f32[1,1], index: 7, kind: input, shape index: {}]   ;;  %s2273_s5 = inlined_call_operand.vmem [shape: f32[32,1], index: 5, kind: input, shape index: {}]   ;;  %s2274_s4 = inlined_call_operand.vmem [shape: bf16[32,32], index: 4, kind: input, shape index: {}]   ;;  %s2275_s6 = inlined_call_operand.vmem [shape: bf16[1,32], index: 6, kind: input, shape index: {}]   ;;  %s2276_s8 = inlined_call_operand.vmem [shape: f32[1,128], index: 8, kind: output, shape index: {}]  }
   0x1   :  { %v42_v2 = vld [vmem:[%s2268_s0] ss:$8 sm:$0x3]  ;;  %v1245_v3 = vld [vmem:[%s2268_s0 + $0x1] ss:$8 sm:$0x3]  ;;  %149 = vmatprep.mubr.bf16.mxu0 %v1507_v4  ;;  %258 = vmatprep.mubr.bf16.mxu1 %v1507_v4  ;;  %v13_v36 = vstv %s2272_s7 }
   0x2   :  { %v1556_v1 = vshrl.u32 %v34_v0, 7  ;;  %1496 = vset.pattern.permute.xlu0 %v1507_v4  ;;  %1497 = vset.pattern.permute.xlu1 %v1507_v4  ;;  %v1274_v16 = vld [vmem:[%s2268_s0 + $0x2] ss:$8 sm:$0x3]  ;;  %14 = vst [vmem:[#allocation2] sm:$0x1] %v13_v36 }
   0x3   :  { %v1303_v20 = vld [vmem:[%s2268_s0 + $0x3] ss:$8 sm:$0x3]  ;;  %v1332_v41 = vld [vmem:[%s2268_s0 + $0x4] ss:$8 sm:$0x3] }
   0x4   :  { %v1567_v5 = vadd.s32 8, %v1556_v1  ;;  %v1570_v6 = vsub.s32 1, %v1556_v1  ;;  %v1573_v7 = vsub.s32 0, %v1556_v1  ;;  %v1578_v8 = vadd.s32 16, %v1556_v1  ;;  %v1747_v35 = vld [vmem:[%s2269_s1] sm:$0xff]   ;;  %v960_v37 = vld [vmem:[%s2271_s3 + $0x18] sm:$0xff] }
   0x5   :  { %v1581_v9 = vadd.s32 24, %v1556_v1  ;;  %v1594_v14 = vadd.s32 32, %v1556_v1  ;;  %v1597_v15 = vadd.s32 40, %v1556_v1  ;;  %v1620_v18 = vadd.s32 48, %v1556_v1  ;;  %v1057_v38 = vld [vmem:[%s2273_s5] sm:$0xff]  ;;  %v1058_v39 = vld [vmem:[%s2273_s5 + $0x8] sm:$0xff] }
   0x6   :  { %v50_v10 = vrot.slane %v42_v2, %v1570_v6  ;;  %v1585_v11 = vrot.slane %v1245_v3, %v1570_v6  ;;  %v1588_v12 = vrot.slane %v42_v2, %v1573_v7  ;;  %v1591_v13 = vrot.slane %v1245_v3, %v1573_v7  ;;  %v1361_v43 = vld [vmem:[%s2268_s0 + $0x5] ss:$8 sm:$0x3]  ;;  %v1390_v63 = vld [vmem:[%s2268_s0 + $0x6] ss:$8 sm:$0x3] }
   0x7   :  { %v1628_v19 = vrot.slane %v1274_v16, %v1570_v6  ;;  %v1688_v26 = vrot.slane %v1274_v16, %v1573_v7  ;;  %v1691_v27 = vrot.slane %v1303_v20, %v1570_v6  ;;  %v1710_v32 = vrot.slane %v1303_v20, %v1573_v7  ;;  %v1419_v2 = vld [vmem:[%s2268_s0 + $0x7] ss:$8 sm:$0x3]  ;;  %v1059_v40 = vld [vmem:[%s2273_s5 + $0x10] sm:$0xff] }
   0x8   :  { %vm52_vm0 = vcmp.eq.s32.totalorder %v1556_v1, %v50_v10  ;;  %vm54_vm1 = vcmp.eq.s32.totalorder %v1567_v5, %v50_v10  ;;  %vm171_vm2 = vcmp.eq.s32.totalorder %v1556_v1, %v1585_v11  ;;  %vm173_vm3 = vcmp.eq.s32.totalorder %v1567_v5, %v1585_v11 }
   0x9   :  { %vm1231_vm4 = vmpackc.low %vm54_vm1, %vm52_vm0  ;;  %vm51_vm5 = vcmp.eq.s32.totalorder %v1556_v1, %v1588_v12  ;;  %vm53_vm6 = vcmp.eq.s32.totalorder %v1567_v5, %v1588_v12  ;;  %vm170_vm7 = vcmp.eq.s32.totalorder %v1556_v1, %v1591_v13  ;;  %vm172_vm8 = vcmp.eq.s32.totalorder %v1567_v5, %v1591_v13  ;;  %v1153_v42 = vld [vmem:[#allocation2] sm:$0x1] }
   0xa   :  { %1232 = vmatprep.subr.msk.bf16.mxu0 %vm1231_vm4, %v1508_v17  ;;  %vm1260_vm9 = vmpackc.low %vm173_vm3, %vm171_vm2  ;;  %vm56_vm10 = vcmp.eq.s32.totalorder %v1578_v8, %v50_v10  ;;  %vm58_vm11 = vcmp.eq.s32.totalorder %v1581_v9, %v50_v10  ;;  %vm175_vm13 = vcmp.eq.s32.totalorder %v1578_v8, %v1585_v11  ;;  %vm177_vm14 = vcmp.eq.s32.totalorder %v1581_v9, %v1585_v11 }
   0xb   :  { %1261 = vmatprep.subr.msk.bf16.mxu1 %vm1260_vm9, %v1508_v17  ;;  %vm1233_vm12 = vmpackc.low %vm53_vm6, %vm51_vm5  ;;  %vm55_vm0 = vcmp.eq.s32.totalorder %v1578_v8, %v1588_v12  ;;  %vm57_vm1 = vcmp.eq.s32.totalorder %v1581_v9, %v1588_v12  ;;  %vm174_vm2 = vcmp.eq.s32.totalorder %v1578_v8, %v1591_v13  ;;  %vm176_vm3 = vcmp.eq.s32.totalorder %v1581_v9, %v1591_v13 }
   0xc   :  { %1234 = vmatpush1.bf16.msk.msra.mxu0 %vm1233_vm12, %v1508_v17  ;;  %vm1262_vm15 = vmpackc.low %vm172_vm8, %vm170_vm7  ;;  %vm60_vm5 = vcmp.eq.s32.totalorder %v1594_v14, %v50_v10  ;;  %vm62_vm6 = vcmp.eq.s32.totalorder %v1597_v15, %v50_v10  ;;  %vm179_vm7 = vcmp.eq.s32.totalorder %v1594_v14, %v1585_v11  ;;  %vm181_vm8 = vcmp.eq.s32.totalorder %v1597_v15, %v1585_v11 }
   0xd   :  { %1263 = vmatpush1.bf16.msk.msra.mxu1 %vm1262_vm15, %v1508_v17  ;;  %vm1235_vm4 = vmpackc.low %vm58_vm11, %vm56_vm10  ;;  %vm64_vm10 = vcmp.eq.s32.totalorder %v1620_v18, %v50_v10  ;;  %vm183_vm11 = vcmp.eq.s32.totalorder %v1620_v18, %v1585_v11  ;;  %vm63_vm12 = vcmp.eq.s32.totalorder %v1620_v18, %v1588_v12  ;;  %vm182_vm15 = vcmp.eq.s32.totalorder %v1620_v18, %v1591_v13 }
   0xe   :  { %1236 = vmatprep.subr.msk.bf16.mxu0 %vm1235_vm4, %v1508_v17  ;;  %vm1264_vm9 = vmpackc.low %vm177_vm14, %vm175_vm13  ;;  %v1229_v22 = vsel %vm64_vm10, 1.0, %v1509_v21  ;;  %v1259_v23 = vsel %vm183_vm11, 1.0, %v1509_v21  ;;  %v1228_v24 = vsel %vm63_vm12, 1.0, %v1509_v21  ;;  %v1258_v25 = vsel %vm182_vm15, 1.0, %v1509_v21 }
   0xf   :  { %1265 = vmatprep.subr.msk.bf16.mxu1 %vm1264_vm9, %v1508_v17  ;;  %vm1237_vm13 = vmpackc.low %vm57_vm1, %vm55_vm0  ;;  %vm59_vm0 = vcmp.eq.s32.totalorder %v1594_v14, %v1588_v12  ;;  %vm61_vm1 = vcmp.eq.s32.totalorder %v1597_v15, %v1588_v12  ;;  %v100_v28 = vpack.c.bf16 %v1229_v22, %v1229_v22  ;;  %v99_v29 = vpack.c.bf16 %v1228_v24, %v1228_v24 }
  0x10   :  { %1238 = vmatpush1.bf16.msk.msra.mxu0 %vm1237_vm13, %v1508_v17  ;;  %vm1266_vm14 = vmpackc.low %vm176_vm3, %vm174_vm2  ;;  %vm178_vm2 = vcmp.eq.s32.totalorder %v1594_v14, %v1591_v13  ;;  %vm180_vm3 = vcmp.eq.s32.totalorder %v1597_v15, %v1591_v13  ;;  %vm2277_vm10 = vcmask 1040384   ;;  %v219_v30 = vpack.c.bf16 %v1259_v23, %v1259_v23 }
  0x11   :  { %1267 = vmatpush1.bf16.msk.msra.mxu1 %vm1266_vm14, %v1508_v17  ;;  %vm1239_vm4 = vmpackc.low %vm62_vm6, %vm60_vm5  ;;  %v218_v31 = vpack.c.bf16 %v1258_v25, %v1258_v25  ;;  %vm284_vm6 = vcmp.eq.s32.totalorder %v1556_v1, %v1628_v19  ;;  %vm397_vm11 = vcmp.eq.s32.totalorder %v1556_v1, %v1691_v27  ;;  %vm399_vm12 = vcmp.eq.s32.totalorder %v1567_v5, %v1691_v27 }
  0x12   :  { %1240 = vmatprep.subr.msk.bf16.mxu0 %vm1239_vm4, %v1508_v17  ;;  %vm1268_vm9 = vmpackc.low %vm181_vm8, %vm179_vm7  ;;  %vm286_vm7 = vcmp.eq.s32.totalorder %v1567_v5, %v1628_v19  ;;  %v112_v33 = vsel %vm2277_vm10, %v99_v29, 0  ;;  %vm283_vm15 = vcmp.eq.s32.totalorder %v1556_v1, %v1688_v26  ;;  %vm285_vm13 = vcmp.eq.s32.totalorder %v1567_v5, %v1688_v26 }
  0x13   :  { %1269 = vmatprep.subr.msk.bf16.mxu1 %vm1268_vm9, %v1508_v17  ;;  %vm1241_vm5 = vmpackc.low %vm61_vm1, %vm59_vm0  ;;  %v221_v34 = vsel %vm2277_vm10, %v218_v31, 0  ;;  %vm396_vm0 = vcmp.eq.s32.totalorder %v1556_v1, %v1710_v32  ;;  %vm398_vm1 = vcmp.eq.s32.totalorder %v1567_v5, %v1710_v32  ;;  %vm2278_vm9 = vcmask 408576  }
  0x14   :  { %1242 = vmatpush1.bf16.msk.msra.mxu0 %vm1241_vm5, %v1508_v17  ;;  %vm1270_vm8 = vmpackc.low %vm180_vm3, %vm178_vm2  ;;  %vm288_vm2 = vcmp.eq.s32.totalorder %v1578_v8, %v1628_v19  ;;  %vm290_vm3 = vcmp.eq.s32.totalorder %v1581_v9, %v1628_v19  ;;  %v1877_v48 = vrot.slane %v1332_v41, %v1570_v6  ;;  %v1883_v49 = vrot.slane %v1361_v43, %v1570_v6 }
  0x15   :  { %1271 = vmatpush1.bf16.msk.msra.mxu1 %vm1270_vm8, %v1508_v17  ;;  %1243 = vmatprep.subr.msk.bf16.mxu0 %vm2277_vm10, %v100_v28  ;;  %vm1289_vm14 = vmpackc.low %vm286_vm7, %vm284_vm6  ;;  %vm401_vm6 = vcmp.eq.s32.totalorder %v1578_v8, %v1691_v27  ;;  %vm403_vm7 = vcmp.eq.s32.totalorder %v1581_v9, %v1691_v27  ;;  %v1896_v52 = vrot.slane %v1332_v41, %v1573_v7  ;;  %v1060_v41 = vld [vmem:[%s2273_s5 + $0x18] sm:$0xff] }
  0x16   :  { %1272 = vmatprep.subr.msk.bf16.mxu1 %vm2277_vm10, %v219_v30  ;;  %vm1318_vm4 = vmpackc.low %vm399_vm12, %vm397_vm11  ;;  %vm287_vm11 = vcmp.eq.s32.totalorder %v1578_v8, %v1688_v26  ;;  %vm289_vm12 = vcmp.eq.s32.totalorder %v1581_v9, %v1688_v26  ;;  %vm295_vm10 = vcmp.eq.s32.totalorder %v1620_v18, %v1688_v26  ;;  %v1903_v55 = vrot.slane %v1361_v43, %v1573_v7 }
  0x17   :  { %vm1753_vm5 = vmpackc.low %vm285_vm13, %vm283_vm15  ;;  %vm400_vm13 = vcmp.eq.s32.totalorder %v1578_v8, %v1710_v32  ;;  %v1287_v45 = vsel %vm295_vm10, 1.0, %v1509_v21  ;;  %v2055_v13 = vrot.slane %v1390_v63, %v1570_v6  ;;  %v2061_v16 = vrot.slane %v1419_v2, %v1570_v6 }
  0x18   :  { %124 = vmatpush1.bf16.msra.mxu0 %v112_v33  ;;  %vm1762_vm8 = vmpackc.low %vm398_vm1, %vm396_vm0  ;;  %vm292_vm0 = vcmp.eq.s32.totalorder %v1594_v14, %v1628_v19  ;;  %v331_v51 = vpack.c.bf16 %v1287_v45, %v1287_v45  ;;  %v2074_v22 = vrot.slane %v1390_v63, %v1573_v7  ;;  %v2081_v24 = vrot.slane %v1419_v2, %v1573_v7  ;;  %v957_v33 = vld [vmem:[%s2271_s3] sm:$0xff] }
  0x19   :  { %233 = vmatpush1.bf16.msra.mxu1 %v221_v34  ;;  %1290 = vmatprep.subr.msk.bf16.mxu0 %vm1289_vm14, %v1508_v17  ;;  %vm1771_vm15 = vmpackc.low %vm290_vm3, %vm288_vm2  ;;  %vm402_vm14 = vcmp.eq.s32.totalorder %v1581_v9, %v1710_v32  ;;  %vm296_vm3 = vcmp.eq.s32.totalorder %v1620_v18, %v1628_v19  ;;  %vm409_vm2 = vcmp.eq.s32.totalorder %v1620_v18, %v1691_v27  ;;  %v959_v34 = vld [vmem:[%s2271_s3 + $0x10] sm:$0xff] }
  0x1a   :  { %1319 = vmatprep.subr.msk.bf16.mxu1 %vm1318_vm4, %v1508_v17  ;;  %vm1783_vm1 = vmpackc.low %vm403_vm7, %vm401_vm6  ;;  %vm294_vm4 = vcmp.eq.s32.totalorder %v1597_v15, %v1628_v19  ;;  %vm407_vm7 = vcmp.eq.s32.totalorder %v1597_v15, %v1691_v27  ;;  %v1288_v44 = vsel %vm296_vm3, 1.0, %v1509_v21  ;;  %v1317_v46 = vsel %vm409_vm2, 1.0, %v1509_v21  ;;  %963 = vperm.xlu0 %1496, %v957_v33  }
  0x1b   :  { %1244 = vmatmul.mubr.msk.bf16.vlgmr.msra.gmra.mrb[0].mxu0 %vm2278_vm9, %v1747_v35  ;;  %vm1803_vm6 = vmpackc.low %vm289_vm12, %vm287_vm11  ;;  %vm291_vm11 = vcmp.eq.s32.totalorder %v1594_v14, %v1688_v26  ;;  %vm293_vm12 = vcmp.eq.s32.totalorder %v1597_v15, %v1688_v26  ;;  %v332_v50 = vpack.c.bf16 %v1288_v44, %v1288_v44  ;;  %v445_v53 = vpack.c.bf16 %v1317_v46, %v1317_v46 }
  0x1c   :  { %1273 = vmatmul.mubr.msk.bf16.vlgmr.msra.gmra.mrb[0].mxu1 %vm2278_vm9, %v1747_v35  ;;  %1292 = vmatpush1.bf16.msk.msra.mxu0 %vm1753_vm5, %v1508_v17  ;;  %vm408_vm9 = vcmp.eq.s32.totalorder %v1620_v18, %v1710_v32  ;;  %vm1828_vm5 = vmpackc.low %vm402_vm14, %vm400_vm13  ;;  %vm2291_vm13 = vcmp.eq.s32.totalorder %v1594_v14, %v1691_v27  ;;  %vm623_vm2 = vcmp.eq.s32.totalorder %v1556_v1, %v1883_v49 }
  0x1d   :  { %1321 = vmatpush1.bf16.msk.msra.mxu1 %vm1762_vm8, %v1508_v17  ;;  %1294 = vmatprep.subr.msk.bf16.mxu0 %vm1771_vm15, %v1508_v17  ;;  %vm1297_vm8 = vmpackc.low %vm294_vm4, %vm292_vm0  ;;  %vm404_vm15 = vcmp.eq.s32.totalorder %v1594_v14, %v1710_v32  ;;  %vm406_vm0 = vcmp.eq.s32.totalorder %v1597_v15, %v1710_v32  ;;  %v1316_v47 = vsel %vm408_vm9, 1.0, %v1509_v21  ;;  %vm512_vm4 = vcmp.eq.s32.totalorder %v1567_v5, %v1877_v48 }
  0x1e   :  { %1323 = vmatprep.subr.msk.bf16.mxu1 %vm1783_vm1, %v1508_v17  ;;  %371 = vmatprep.mubr.bf16.mxu0 %v1507_v4  ;;  %vm1326_vm14 = vmpackc.low %vm407_vm7, %vm2291_vm13  ;;  %v444_v54 = vpack.c.bf16 %v1316_v47, %v1316_v47  ;;  %vm510_vm1 = vcmp.eq.s32.totalorder %v1556_v1, %v1877_v48  ;;  %vm625_vm3 = vcmp.eq.s32.totalorder %v1567_v5, %v1883_v49 }
  0x1f   :  { %484 = vmatprep.mubr.bf16.mxu1 %v1507_v4  ;;  %vm1299_vm10 = vmpackc.low %vm293_vm12, %vm291_vm11  ;;  %vm511_vm11 = vcmp.eq.s32.totalorder %v1567_v5, %v1896_v52  ;;  %vm622_vm13 = vcmp.eq.s32.totalorder %v1556_v1, %v1903_v55  ;;  %973 = vperm.xlu1 %1497, %v959_v34  }
  0x20   :  { %1296 = vmatpush1.bf16.msk.msra.mxu0 %vm1803_vm6, %v1508_v17  ;;  %vm1328_vm9 = vmpackc.low %vm406_vm0, %vm404_vm15  ;;  %vm2292_vm6 = vcmask 1040384  }
  0x21   :  { %1325 = vmatpush1.bf16.msk.msra.mxu1 %vm1828_vm5, %v1508_v17  ;;  %1298 = vmatprep.subr.msk.bf16.mxu0 %vm1297_vm8, %v1508_v17  ;;  %vm2293_vm7 = vmmov %vm2292_vm6  ;;  %vm509_vm5 = vcmp.eq.s32.totalorder %v1556_v1, %v1896_v52 }
  0x22   :  { %1327 = vmatprep.subr.msk.bf16.mxu1 %vm1326_vm14, %v1508_v17  ;;  %v334_v56 = vsel %vm2293_vm7, %v331_v51, 0  ;;  %vm2294_vm8 = vmmov %vm2292_vm6  ;;  %vm624_vm14 = vcmp.eq.s32.totalorder %v1567_v5, %v1903_v55  ;;  %vm515_vm7 = vcmp.eq.s32.totalorder %v1581_v9, %v1896_v52 }
  0x23   :  { %vm2295_vm12 = vmmov %vm2292_vm6  ;;  %978 = vperm.xlu1 %1497, %v960_v37  }
  0x24   :  { %1300 = vmatpush1.bf16.msk.msra.mxu0 %vm1299_vm10, %v1508_v17  ;;  %v447_v57 = vsel %vm2295_vm12, %v444_v54, 0  ;;  %vm1347_vm15 = vmpackc.low %vm512_vm4, %vm510_vm1  ;;  %vm514_vm10 = vcmp.eq.s32.totalorder %v1578_v8, %v1877_v48  ;;  %vm627_vm1 = vcmp.eq.s32.totalorder %v1578_v8, %v1883_v49  ;;  %vm629_vm4 = vcmp.eq.s32.totalorder %v1581_v9, %v1883_v49 }
  0x25   :  { %1329 = vmatpush1.bf16.msk.msra.mxu1 %vm1328_vm9, %v1508_v17  ;;  %1301 = vmatprep.subr.msk.bf16.mxu0 %vm2292_vm6, %v332_v50  ;;  %vm1376_vm0 = vmpackc.low %vm625_vm3, %vm623_vm2  ;;  %vm516_vm9 = vcmp.eq.s32.totalorder %v1581_v9, %v1877_v48  ;;  %vm513_vm3 = vcmp.eq.s32.totalorder %v1578_v8, %v1896_v52 }
  0x26   :  { %1330 = vmatprep.subr.msk.bf16.mxu1 %vm2294_vm8, %v445_v53  ;;  %vm1931_vm6 = vmpackc.low %vm511_vm11, %vm509_vm5  ;;  %vm626_vm11 = vcmp.eq.s32.totalorder %v1578_v8, %v1903_v55  ;;  %vm628_vm8 = vcmp.eq.s32.totalorder %v1581_v9, %v1903_v55 }
  0x27   :  { %vm1940_vm2 = vmpackc.low %vm624_vm14, %vm622_vm13  ;;  %vm520_vm14 = vcmp.eq.s32.totalorder %v1597_v15, %v1877_v48  ;;  %1068 = vperm.xlu1 %1497, %v1058_v39  }
  0x28   :  { %346 = vmatpush1.bf16.msra.mxu0 %v334_v56  ;;  %vm1949_vm5 = vmpackc.low %vm516_vm9, %vm514_vm10  ;;  %vm522_vm10 = vcmp.eq.s32.totalorder %v1620_v18, %v1877_v48  ;;  %vm521_vm9 = vcmp.eq.s32.totalorder %v1620_v18, %v1896_v52 }
  0x29   :  { %459 = vmatpush1.bf16.msra.mxu1 %v447_v57  ;;  %1348 = vmatprep.subr.msk.bf16.mxu0 %vm1347_vm15, %v1508_v17  ;;  %vm2302_vm15 = vcmask 408576   ;;  %vm1961_vm13 = vmpackc.low %vm629_vm4, %vm627_vm1  ;;  %vm633_vm4 = vcmp.eq.s32.totalorder %v1597_v15, %v1883_v49  ;;  %v1346_v3 = vsel %vm522_vm10, 1.0, %v1509_v21  ;;  %v1345_v10 = vsel %vm521_vm9, 1.0, %v1509_v21 }
  0x2a   :  { %1377 = vmatprep.subr.msk.bf16.mxu1 %vm1376_vm0, %v1508_v17  ;;  %vm631_vm0 = vcmp.eq.s32.totalorder %v1594_v14, %v1883_v49  ;;  %vm2305_vm12 = vmmov %vm2302_vm15  ;;  %v558_v19 = vpack.c.bf16 %v1346_v3, %v1346_v3  ;;  %v557_v20 = vpack.c.bf16 %v1345_v10, %v1345_v10  ;;  %vm736_vm10 = vcmp.eq.s32.totalorder %v1556_v1, %v2055_v13 }
  0x2b   :  { %1302 = vmatmul.mubr.msk.bf16.vlgmr.msra.gmra.mrb[4].mxu0 %vm2302_vm15, %v1747_v35  ;;  %vm1981_vm1 = vmpackc.low %vm515_vm7, %vm513_vm3  ;;  %vm635_vm15 = vcmp.eq.s32.totalorder %v1620_v18, %v1883_v49  ;;  %vm517_vm3 = vcmp.eq.s32.totalorder %v1594_v14, %v1896_v52  ;;  %vm738_vm9 = vcmp.eq.s32.totalorder %v1567_v5, %v2055_v13  ;;  %1078 = vperm.xlu1 %1497, %v1060_v41  }
  0x2c   :  { %1331 = vmatmul.mubr.msk.bf16.vlgmr.msra.gmra.mrb[4].mxu1 %vm2305_vm12, %v1747_v35  ;;  %1350 = vmatpush1.bf16.msk.msra.mxu0 %vm1931_vm6, %v1508_v17  ;;  %vm634_vm12 = vcmp.eq.s32.totalorder %v1620_v18, %v1903_v55  ;;  %vm2006_vm6 = vmpackc.low %vm628_vm8, %vm626_vm11  ;;  %vm630_vm11 = vcmp.eq.s32.totalorder %v1594_v14, %v1903_v55  ;;  %v1375_v11 = vsel %vm635_vm15, 1.0, %v1509_v21  ;;  %vm2311_vm15 = vcmask 1040384  }
  0x2d   :  { %1379 = vmatpush1.bf16.msk.msra.mxu1 %vm1940_vm2, %v1508_v17  ;;  %1352 = vmatprep.subr.msk.bf16.mxu0 %vm1949_vm5, %v1508_v17  ;;  %vm2310_vm2 = vcmp.eq.s32.totalorder %v1594_v14, %v1877_v48  ;;  %vm519_vm5 = vcmp.eq.s32.totalorder %v1597_v15, %v1896_v52  ;;  %vm1384_vm8 = vmpackc.low %vm633_vm4, %vm631_vm0  ;;  %v1374_v12 = vsel %vm634_vm12, 1.0, %v1509_v21  ;;  %v671_v6 = vpack.c.bf16 %v1375_v11, %v1375_v11 }
  0x2e   :  { %1381 = vmatprep.subr.msk.bf16.mxu1 %vm1961_vm13, %v1508_v17  ;;  %vm1355_vm7 = vmpackc.low %vm520_vm14, %vm2310_vm2  ;;  %597 = vmatprep.mubr.bf16.mxu0 %v1507_v4  ;;  %vm632_vm13 = vcmp.eq.s32.totalorder %v1597_v15, %v1903_v55  ;;  %v670_v23 = vpack.c.bf16 %v1374_v12, %v1374_v12  ;;  %vm851_vm4 = vcmp.eq.s32.totalorder %v1567_v5, %v2061_v16 }
  0x2f   :  { %710 = vmatprep.mubr.bf16.mxu1 %v1507_v4  ;;  %vm1357_vm14 = vmpackc.low %vm519_vm5, %vm517_vm3  ;;  %vm737_vm3 = vcmp.eq.s32.totalorder %v1567_v5, %v2074_v22 }
  0x30   :  { %1354 = vmatpush1.bf16.msk.msra.mxu0 %vm1981_vm1, %v1508_v17  ;;  %vm1386_vm0 = vmpackc.low %vm632_vm13, %vm630_vm11  ;;  %vm849_vm1 = vcmp.eq.s32.totalorder %v1556_v1, %v2061_v16  ;;  %vm848_vm11 = vcmp.eq.s32.totalorder %v1556_v1, %v2081_v24 }
  0x31   :  { %1383 = vmatpush1.bf16.msk.msra.mxu1 %vm2006_vm6, %v1508_v17  ;;  %1356 = vmatprep.subr.msk.bf16.mxu0 %vm1355_vm7, %v1508_v17  ;;  %vm2312_vm12 = vmmov %vm2311_vm15  ;;  %vm735_vm6 = vcmp.eq.s32.totalorder %v1556_v1, %v2074_v22 }
  0x32   :  { %1385 = vmatprep.subr.msk.bf16.mxu1 %vm1384_vm8, %v1508_v17  ;;  %v560_v25 = vsel %vm2312_vm12, %v557_v20, 0  ;;  %vm2313_vm2 = vmmov %vm2312_vm12  ;;  %vm850_vm8 = vcmp.eq.s32.totalorder %v1567_v5, %v2081_v24  ;;  %vm741_vm12 = vcmp.eq.s32.totalorder %v1581_v9, %v2074_v22 }
  0x33   :  { %vm2314_vm7 = vmmov %vm2313_vm2 }
  0x34   :  { %1358 = vmatpush1.bf16.msk.msra.mxu0 %vm1357_vm14, %v1508_v17  ;;  %v673_v26 = vsel %vm2314_vm7, %v670_v23, 0  ;;  %vm1405_vm5 = vmpackc.low %vm738_vm9, %vm736_vm10  ;;  %vm740_vm14 = vcmp.eq.s32.totalorder %v1578_v8, %v2055_v13  ;;  %vm853_vm10 = vcmp.eq.s32.totalorder %v1578_v8, %v2061_v16  ;;  %vm855_vm9 = vcmp.eq.s32.totalorder %v1581_v9, %v2061_v16 }
  0x35   :  { %1387 = vmatpush1.bf16.msk.msra.mxu1 %vm1386_vm0, %v1508_v17  ;;  %1359 = vmatprep.subr.msk.bf16.mxu0 %vm2311_vm15, %v558_v19  ;;  %vm1434_vm13 = vmpackc.low %vm851_vm4, %vm849_vm1  ;;  %vm742_vm0 = vcmp.eq.s32.totalorder %v1581_v9, %v2055_v13  ;;  %vm739_vm4 = vcmp.eq.s32.totalorder %v1578_v8, %v2074_v22  ;;  %vm744_vm7 = vcmp.eq.s32.totalorder %v1594_v14, %v2055_v13 }
  0x36   :  { %1388 = vmatprep.subr.msk.bf16.mxu1 %vm2313_vm2, %v671_v6  ;;  %vm2109_vm15 = vmpackc.low %vm737_vm3, %vm735_vm6  ;;  %vm852_vm3 = vcmp.eq.s32.totalorder %v1578_v8, %v2081_v24 }
  0x37   :  { %vm2118_vm1 = vmpackc.low %vm850_vm8, %vm848_vm11  ;;  %vm746_vm8 = vcmp.eq.s32.totalorder %v1597_v15, %v2055_v13 }
  0x38   :  { %572 = vmatpush1.bf16.msra.mxu0 %v560_v25  ;;  %vm2127_vm6 = vmpackc.low %vm742_vm0, %vm740_vm14  ;;  %vm748_vm14 = vcmp.eq.s32.totalorder %v1620_v18, %v2055_v13  ;;  %vm747_vm0 = vcmp.eq.s32.totalorder %v1620_v18, %v2074_v22 }
  0x39   :  { %685 = vmatpush1.bf16.msra.mxu1 %v673_v26  ;;  %1406 = vmatprep.subr.msk.bf16.mxu0 %vm1405_vm5, %v1508_v17  ;;  %vm2321_vm5 = vcmask 408576   ;;  %vm1438_vm11 = vmpackc.low %vm855_vm9, %vm853_vm10  ;;  %vm859_vm9 = vcmp.eq.s32.totalorder %v1597_v15, %v2061_v16  ;;  %v1403_v8 = vsel %vm747_vm0, 1.0, %v1509_v21  ;;  %vm2327_vm0 = vcmask 1040384  }
  0x3a   :  { %1435 = vmatprep.subr.msk.bf16.mxu1 %vm1434_vm13, %v1508_v17  ;;  %vm2322_vm2 = vmmov %vm2321_vm5  ;;  %vm745_vm13 = vcmp.eq.s32.totalorder %v1597_v15, %v2074_v22 }
  0x3b   :  { %1360 = vmatmul.mubr.msk.bf16.vlgmr.msra.gmra.mrb[8].mxu0 %vm2321_vm5, %v1747_v35  ;;  %vm2155_vm10 = vmpackc.low %vm741_vm12, %vm739_vm4  ;;  %vm861_vm5 = vcmp.eq.s32.totalorder %v1620_v18, %v2061_v16 }
  0x3c   :  { %1389 = vmatmul.mubr.msk.bf16.vlgmr.msra.gmra.mrb[8].mxu1 %vm2322_vm2, %v1747_v35  ;;  %1408 = vmatpush1.bf16.msk.msra.mxu0 %vm2109_vm15, %v1508_v17  ;;  %vm860_vm2 = vcmp.eq.s32.totalorder %v1620_v18, %v2081_v24  ;;  %vm2325_vm15 = vcmp.eq.s32.totalorder %v1581_v9, %v2081_v24  ;;  %vm1413_vm12 = vmpackc.low %vm746_vm8, %vm744_vm7  ;;  %v1404_v18 = vsel %vm748_vm14, 1.0, %v1509_v21  ;;  %vm858_vm7 = vcmp.eq.s32.totalorder %v1597_v15, %v2081_v24 }
  0x3d   :  { %1437 = vmatpush1.bf16.msk.msra.mxu1 %vm2118_vm1, %v1508_v17  ;;  %1410 = vmatprep.subr.msk.bf16.mxu0 %vm2127_vm6, %v1508_v17  ;;  %vm1440_vm4 = vmpackc.low %vm2325_vm15, %vm852_vm3  ;;  %vm743_vm1 = vcmp.eq.s32.totalorder %v1594_v14, %v2074_v22  ;;  %vm2326_vm6 = vcmp.eq.s32.totalorder %v1594_v14, %v2061_v16  ;;  %v1433_v9 = vsel %vm861_vm5, 1.0, %v1509_v21  ;;  %v1432_v29 = vsel %vm860_vm2, 1.0, %v1509_v21 }
  0x3e   :  { %1439 = vmatprep.subr.msk.bf16.mxu1 %vm1438_vm11, %v1508_v17  ;;  %823 = vmatprep.mubr.bf16.mxu0 %v1507_v4  ;;  %vm1442_vm3 = vmpackc.low %vm859_vm9, %vm2326_vm6  ;;  %vm856_vm11 = vcmp.eq.s32.totalorder %v1594_v14, %v2081_v24  ;;  %v784_v30 = vpack.c.bf16 %v1404_v18, %v1404_v18  ;;  %v783_v14 = vpack.c.bf16 %v1403_v8, %v1403_v8  ;;  %vm991_vm15 = vcmask 261120  }
  0x3f   :  { %936 = vmatprep.mubr.bf16.mxu1 %v1507_v4  ;;  %vm1415_vm8 = vmpackc.low %vm745_vm13, %vm743_vm1  ;;  %v897_v15 = vpack.c.bf16 %v1433_v9, %v1433_v9  ;;  %v896_v31 = vpack.c.bf16 %v1432_v29, %v1432_v29  ;;  %vm2331_vm13 = vcmask 408576  }
  0x40   :  { %1412 = vmatpush1.bf16.msk.msra.mxu0 %vm2155_vm10, %v1508_v17  ;;  %vm1444_vm14 = vmpackc.low %vm858_vm7, %vm856_vm11 }
  0x41   :  { %1441 = vmatpush1.bf16.msk.msra.mxu1 %vm1440_vm4, %v1508_v17  ;;  %1414 = vmatprep.subr.msk.bf16.mxu0 %vm1413_vm12, %v1508_v17  ;;  %vm2328_vm9 = vmmov %vm2327_vm0  ;;  %vm1510_vm4 = vmmov 0  }
  0x42   :  { %1443 = vmatprep.subr.msk.bf16.mxu1 %vm1442_vm3, %v1508_v17  ;;  %v786_v4 = vsel %vm2328_vm9, %v783_v14, 0  ;;  %vm2329_vm10 = vmmov %vm2327_vm0 }
  0x43   :  { %vm2330_vm5 = vmmov %vm2327_vm0 }
  0x44   :  { %1416 = vmatpush1.bf16.msk.msra.mxu0 %vm1415_vm8, %v1508_v17  ;;  %v899_v32 = vsel %vm2330_vm5, %v896_v31, 0  ;;  %vm2332_vm2 = vmmov %vm2331_vm13 }
  0x45   :  { %1445 = vmatpush1.bf16.msk.msra.mxu1 %vm1444_vm14, %v1508_v17  ;;  %1417 = vmatprep.subr.msk.bf16.mxu0 %vm2327_vm0, %v784_v30  ;;  %v1499_v17 = vld [vmem:[%s2270_s2] sm:$0xff]  }
  0x46   :  { %1446 = vmatprep.subr.msk.bf16.mxu1 %vm2329_vm10, %v897_v15 }
  0x48   :  { %798 = vmatpush1.bf16.msra.mxu0 %v786_v4 }
  0x49   :  { %911 = vmatpush1.bf16.msra.mxu1 %v899_v32 }
  0x4b   :  { %1418 = vmatmul.mubr.msk.bf16.vlgmr.msra.gmra.mrb[12].mxu0 %vm2331_vm13, %v1747_v35 }
  0x4c   :  { %1447 = vmatmul.mubr.msk.bf16.vlgmr.msra.gmra.mrb[12].mxu1 %vm2332_vm2, %v1747_v35  ;;  %1472 = vmatprep.mubr.msk.bf16.mxu0 %vm991_vm15, %v1499_v17  ;;  %v958_v35 = vld [vmem:[%s2271_s3 + $0x8] sm:$0xff] }
  0x4d   :  { %968 = vperm.xlu0 %1496, %v958_v35  }
  0x51   :  { %1063 = vperm.xlu0 %1496, %v1057_v38  }
  0x55   :  { %1073 = vperm.xlu0 %1496, %v1059_v40  }
  0x59   :  { %1156 = vperm.xlu0 %1496, %v1153_v42  }
  0xee   :  { %v151_v43 = vpop.f32.mrb[0].mxu0 }
  0xef   :  { %v260_v44 = vpop.f32.mrb[0].mxu1  ;;  %v153_v45 = vpop.f32.mrb[1].mxu0 }
  0xf0   :  { %v269_v46 = vmax.f32 %v151_v43, %v260_v44  ;;  %v262_v47 = vpop.f32.mrb[1].mxu1  ;;  %v155_v48 = vpop.f32.mrb[2].mxu0  ;;  %v1500_v43 = vld [vmem:[%s2270_s2 + $0x8] sm:$0xff]   ;;  %v1501_v44 = vld [vmem:[%s2274_s4] sm:$0xff]  }
  0xf1   :  { %v270_v49 = vmax.f32 %v153_v45, %v262_v47  ;;  %v264_v50 = vpop.f32.mrb[2].mxu1  ;;  %v157_v51 = vpop.f32.mrb[3].mxu0  ;;  %1480 = vmatprep.mubr.msk.bf16.mxu1 %vm991_vm15, %v1501_v44 }
  0xf2   :  { %v271_v52 = vmax.f32 %v155_v48, %v264_v50  ;;  %v266_v53 = vpop.f32.mrb[3].mxu1  ;;  %v974_v45 = vpop.permute.xlu1 %973 }
  0xf3   :  { %v272_v54 = vmax.f32 %v157_v51, %v266_v53 }
  0xf6   :  { %v979_v50 = vpop.permute.xlu1 %978 }
  0xfe   :  { %v373_v55 = vpop.f32.mrb[4].mxu0 }
  0xff   :  { %v382_v56 = vmax.f32 %v269_v46, %v373_v55  ;;  %v486_v57 = vpop.f32.mrb[4].mxu1  ;;  %v375_v58 = vpop.f32.mrb[5].mxu0 }
 0x100   :  { %v383_v59 = vmax.f32 %v270_v49, %v375_v58  ;;  %v488_v60 = vpop.f32.mrb[5].mxu1  ;;  %v377_v61 = vpop.f32.mrb[6].mxu0 }
 0x101   :  { %v495_v62 = vmax.f32 %v382_v56, %v486_v57  ;;  %v384_v63 = vmax.f32 %v271_v52, %v377_v61  ;;  %v490_v0 = vpop.f32.mrb[6].mxu1  ;;  %v379_v2 = vpop.f32.mrb[7].mxu0 }
 0x102   :  { %v496_v3 = vmax.f32 %v383_v59, %v488_v60  ;;  %v385_v10 = vmax.f32 %v272_v54, %v379_v2  ;;  %v492_v11 = vpop.f32.mrb[7].mxu1  ;;  %v964_v46 = vpop.permute.xlu0 %963 }
 0x103   :  { %v497_v12 = vmax.f32 %v384_v63, %v490_v0  ;;  %v1502_v63 = vld [vmem:[%s2274_s4 + $0x8] sm:$0xff]   ;;  %v1069_v2 = vpop.permute.xlu1 %1068 }
 0x104   :  { %v498_v13 = vmax.f32 %v385_v10, %v492_v11 }
 0x106   :  { %v969_v53 = vpop.permute.xlu0 %968 }
 0x10a   :  { %v1064_v0 = vpop.permute.xlu0 %1063 }
 0x10e   :  { %v599_v16 = vpop.f32.mrb[8].mxu0 }
 0x10f   :  { %v608_v19 = vmax.f32 %v495_v62, %v599_v16  ;;  %v712_v20 = vpop.f32.mrb[8].mxu1  ;;  %v601_v22 = vpop.f32.mrb[9].mxu0 }
 0x110   :  { %v609_v6 = vmax.f32 %v496_v3, %v601_v22  ;;  %v714_v23 = vpop.f32.mrb[9].mxu1  ;;  %v603_v24 = vpop.f32.mrb[10].mxu0 }
 0x111   :  { %v721_v25 = vmax.f32 %v608_v19, %v712_v20  ;;  %v610_v26 = vmax.f32 %v497_v12, %v603_v24  ;;  %v716_v27 = vpop.f32.mrb[10].mxu1  ;;  %v605_v1 = vpop.f32.mrb[11].mxu0 }
 0x112   :  { %v722_v5 = vmax.f32 %v609_v6, %v714_v23  ;;  %v611_v28 = vmax.f32 %v498_v13, %v605_v1  ;;  %v718_v18 = vpop.f32.mrb[11].mxu1  ;;  %v1074_v3 = vpop.permute.xlu0 %1073 }
 0x113   :  { %v723_v8 = vmax.f32 %v610_v26, %v716_v27  ;;  %v1079_v13 = vpop.permute.xlu1 %1078 }
 0x114   :  { %v724_v9 = vmax.f32 %v611_v28, %v718_v18 }
 0x116   :  { %v1157_v28 = vpop.permute.xlu0 %1156 }
 0x117   :  { %v1162_v18 = vrot.slane %v1157_v28, %v1573_v7 }
 0x11e   :  { %v825_v29 = vpop.f32.mrb[12].mxu0 }
 0x11f   :  { %v834_v30 = vmax.f32 %v721_v25, %v825_v29  ;;  %v938_v14 = vpop.f32.mrb[12].mxu1  ;;  %v827_v15 = vpop.f32.mrb[13].mxu0 }
 0x120   :  { %v835_v31 = vmax.f32 %v722_v5, %v827_v15  ;;  %v940_v4 = vpop.f32.mrb[13].mxu1  ;;  %v829_v32 = vpop.f32.mrb[14].mxu0  ;;  %v1150_v5 = vld [vmem:[%s2275_s6] sm:$0x1] }
 0x121   :  { %v947_v17 = vmax.f32 %v834_v30, %v938_v14  ;;  %v836_v33 = vmax.f32 %v723_v8, %v829_v32  ;;  %v942_v34 = vpop.f32.mrb[14].mxu1  ;;  %v831_v36 = vpop.f32.mrb[15].mxu0 }
 0x122   :  { %v948_v35 = vmax.f32 %v835_v31, %v940_v4  ;;  %v837_v37 = vmax.f32 %v724_v9, %v831_v36  ;;  %v944_v38 = vpop.f32.mrb[15].mxu1 }
 0x123   :  { %v949_v39 = vmax.f32 %v836_v33, %v942_v34 }
 0x124   :  { %v950_v40 = vmax.f32 %v837_v37, %v944_v38 }
 0x125   :  { %v951_v41 = vpack.c.bf16 %v949_v39, %v947_v17 }
 0x126   :  { %v952_v42 = vpack.c.bf16 %v950_v40, %v948_v35 }
 0x127   :  { %1468 = vmatprep.subr.bf16.mxu0 %v951_v41 }
 0x128   :  { %1469 = vmatpush3.bf16.msra.mxu0 %v951_v41 }
 0x129   :  { %1470 = vmatprep.subr.bf16.mxu0 %v952_v42 }
 0x12c   :  { %1471 = vmatpush3.bf16.msra.mxu0 %v952_v42 }
 0x12d   :  { %1484 = vmatprep.subr.bf16.mxu0 %v1509_v21 }
 0x12f   :  { %1473 = vmatmul.mubr.msk.bf16.vlgmr.msra.gmra.mrb[16].mxu0 %vm991_vm15, %v1500_v43 }
 0x130   :  { %1488 = vmatprep.mubr.msk.bf16.mxu0 %vm1510_vm4, %v1509_v21 }
 0x202   :  { %v1474_v47 = vpop.f32.mrb[16].mxu0 }
 0x203   :  { %v1041_v48 = vadd.f32 %v1474_v47, %v974_v45  ;;  %v1032_v49 = vpop.f32.mrb[17].mxu0 }
 0x204   :  { %v1033_v51 = vadd.f32 %v1032_v49, %v964_v46  ;;  %v1475_v52 = vpop.f32.mrb[18].mxu0 }
 0x205   :  { %v1044_v54 = vadd.f32 %v1475_v52, %v979_v50  ;;  %v1035_v55 = vpop.f32.mrb[19].mxu0  ;;  %v1049_v57 = vmax.f32 %v1041_v48, 0.0 }
 0x206   :  { %v1036_v56 = vadd.f32 %v1035_v55, %v969_v53  ;;  %v1047_v59 = vmax.f32 %v1033_v51, 0.0 }
 0x207   :  { %v1050_v58 = vmax.f32 %v1044_v54, 0.0 }
 0x208   :  { %v1048_v60 = vmax.f32 %v1036_v56, 0.0 }
 0x209   :  { %v1056_v61 = vpack.c.bf16 %v1050_v58, %v1049_v57 }
 0x20a   :  { %v1055_v62 = vpack.c.bf16 %v1048_v60, %v1047_v59 }
 0x20c   :  { %1476 = vmatprep.subr.bf16.mxu1 %v1055_v62 }
 0x20d   :  { %1477 = vmatpush3.bf16.msra.mxu1 %v1055_v62 }
 0x20e   :  { %1478 = vmatprep.subr.bf16.mxu1 %v1056_v61 }
 0x211   :  { %1479 = vmatpush3.bf16.msra.mxu1 %v1056_v61 }
 0x214   :  { %1481 = vmatmul.mubr.msk.bf16.vlgmr.msra.gmra.mrb[16].mxu1 %vm991_vm15, %v1502_v63 }
 0x2e7   :  { %v1482_v10 = vpop.f32.mrb[16].mxu1 }
 0x2e8   :  { %v1140_v11 = vadd.f32 %v1482_v10, %v1074_v3  ;;  %v1131_v12 = vpop.f32.mrb[17].mxu1 }
 0x2e9   :  { %v1132_v16 = vadd.f32 %v1131_v12, %v1064_v0  ;;  %v1483_v19 = vpop.f32.mrb[18].mxu1 }
 0x2ea   :  { %v1143_v20 = vadd.f32 %v1483_v19, %v1079_v13  ;;  %v1134_v22 = vpop.f32.mrb[19].mxu1  ;;  %v1148_v23 = vmax.f32 %v1140_v11, 0.0 }
 0x2eb   :  { %v1135_v6 = vadd.f32 %v1134_v22, %v1069_v2  ;;  %v1146_v25 = vmax.f32 %v1132_v16, 0.0 }
 0x2ec   :  { %v1149_v24 = vmax.f32 %v1143_v20, 0.0 }
 0x2ed   :  { %v1147_v26 = vmax.f32 %v1135_v6, 0.0 }
 0x2ee   :  { %v1152_v27 = vpack.c.bf16 %v1149_v24, %v1148_v23 }
 0x2ef   :  { %v1151_v1 = vpack.c.bf16 %v1147_v26, %v1146_v25 }
 0x2f1   :  { %1485 = vmatpush3.bf16.msra.mxu0 %v1151_v1 }
 0x2f2   :  { %1486 = vmatprep.subr.bf16.mxu0 %v1509_v21 }
 0x2f5   :  { %1487 = vmatpush3.bf16.msra.mxu0 %v1152_v27 }
 0x2f8   :  { %1489 = vmatmul.mubr.msk.bf16.vlgmr.msra.gmra.mrb[20].mxu0 %vm991_vm15, %v1150_v5 }
 0x3cb   :  { %v1200_v8 = vpop.f32.mrb[20].mxu0 }
 0x3cc   :  { %v1201_v9 = vadd.f32 %v1200_v8, %v1162_v18  ;;  %v1490_v29 = vpop.f32.mrb[21].mxu0 }
 0x3cd   :  { %v1203_v30 = vpop.f32.mrb[22].mxu0 }
 0x3ce   :  { %v1206_v14 = vsub.f32 0.0, %v1201_v9  ;;  %v1491_v15 = vpop.f32.mrb[23].mxu0 }
 0x3d0   :  { %v1207_v31 = vmul.f32 1.442695, %v1206_v14 }
 0x3d2   :  { %1503 = vpow2.f32 %v1207_v31 }
 0x3dc   :  { %v1504_v4 = vpop.eup %1503 }
 0x3dd   :  { %v1209_v21 = vadd.f32 1.0, %v1504_v4 }
 0x3df   :  { %1505 = vrcp.f32 %v1209_v21 }
 0x3e9   :  { %v1506_v32 = vpop.eup %1505 }
 0x3ea   :  { %1211 = vst [vmem:[%s2276_s8] sm:$0x1] %v1506_v32 }

</bundles_post_ra>
